<compile_context>
chip_gen: v7x
topology: tpu7x:2x2x1
jax: 0.10.0
libtpu: 0.0.40
codegen_flags: <defaults>
</compile_context>

<pallas_src>
import jax
import jax.numpy as jnp
from jax.experimental import pallas as pl
from jax.experimental.pallas import tpu as pltpu


def _round_up(n: int, m: int) -> int:
    return ((n + m - 1) // m) * m


def _pad8(n: int) -> int:
    return _round_up(n, 8)


def _pad128(n: int) -> int:
    return _round_up(n, 128)


def _make_s_encoder_kernel(n_hidden: int, n_batches: int, matmul_dtype, exact_recip: bool):
    """Kernel closure for an MLP with `n_hidden` hidden layers (transposed layout)."""
    use_select_gather = n_batches <= 32

    def kernel(*refs):
        idx_ref = refs[0]          # (1, 1, TB) int32 batch indices for this tile
        out_ref = refs[-1]         # (dim_out, TB) float32
        p = refs[1:-1]             # parameter refs (VMEM-resident)

        idx = idx_ref[0]           # (1, TB) int32
        tb = idx.shape[1]

        def first_layer(w_ref, b_ref):
            # x0 = W0[:, idx] + b0  ==  (one_hot(idx) @ W0^T)^T + b0.
            # w_ref: (D, n_batches) f32 (kept f32: it's a pure row/col selection),
            # b_ref: (D, 1) f32.
            w = w_ref[...]
            d = w.shape[0]
            if use_select_gather:
                acc = jnp.broadcast_to(b_ref[...], (d, tb))
                for k in range(n_batches):
                    mask = (idx == k).astype(jnp.float32)      # (1, TB) lane-dense
                    acc = acc + w[:, k:k + 1] * mask           # (D,1)*(1,TB) -> (D,TB)
                return acc
            # Larger n_batches: build the one-hot and use the MXU.
            rows = jax.lax.broadcasted_iota(jnp.int32, (n_batches, tb), 0)
            onehot = (rows == idx).astype(matmul_dtype)        # (n_batches, TB)
            return jnp.dot(w.astype(matmul_dtype), onehot,
                           preferred_element_type=jnp.float32) + b_ref[...]

        def ln_mish(h, g_ref, beta_ref):
            # LayerNorm over the feature (sublane) axis, eps=1e-5, biased variance.
            # Two-pass variance: matches the torch reference and avoids the
            # mean(h^2)-mu^2 cancellation concern.
            mu = jnp.mean(h, axis=0, keepdims=True)            # (1, TB)
            d = h - mu
            var = jnp.mean(d * d, axis=0, keepdims=True)
            hn = d * jax.lax.rsqrt(var + 1e-5)
            hn = hn * g_ref[...] + beta_ref[...]               # (D,1) broadcast over lanes
            # Mish: x * tanh(softplus(x)) with tanh(log(t)) = 1 - 2/(t^2+1), t = 1+e^x.
            # exp overflow -> t^2+1 = inf -> frac = 0 -> mish -> x (correct limit).
            t = 1.0 + jnp.exp(hn)
            denom = t * t + 1.0
            if exact_recip:
                frac = 2.0 / denom
            else:
                frac = 2.0 * pl.reciprocal(denom, approx=True)
            # TODO(synk): dropout omitted (eval-mode forward; identity at inference)
            return hn * (1.0 - frac)

        if n_hidden == 0:
            out_ref[...] = first_layer(p[0], p[1]).astype(out_ref.dtype)
            return

        # Hidden layer 0: gather replaces Linear(one_hot).
        x = ln_mish(first_layer(p[0], p[1]), p[2], p[3])

        # Remaining hidden layers: Linear -> LayerNorm -> Mish.
        for li in range(1, n_hidden):
            w, b, g, beta = p[4 * li: 4 * li + 4]
            h = jnp.dot(w[...], x.astype(matmul_dtype),
                        preferred_element_type=jnp.float32) + b[...]
            x = ln_mish(h, g, beta)

        # Output layer: plain Linear (lane-dense (dim_out, TB) store).
        w, b = p[4 * n_hidden], p[4 * n_hidden + 1]
        out_ref[...] = (jnp.dot(w[...], x.astype(matmul_dtype),
                                preferred_element_type=jnp.float32)
                        + b[...]).astype(out_ref.dtype)

    return kernel


def init_s_encoder_params(key, n_batches, dims_enc_s, dim_z):
    """Deterministic PyTorch-style init, PyTorch nn.Linear layout: W is (out, in)."""
    feats = [n_batches] + list(dims_enc_s) + [dim_z * 2]
    params = []
    for i in range(1, len(feats)):
        fan_in, fan_out = feats[i - 1], feats[i]
        key, kw, kb = jax.random.split(key, 3)
        bound = 1.0 / float(fan_in) ** 0.5
        W = jax.random.uniform(kw, (fan_out, fan_in), jnp.float32, -bound, bound)
        b = jax.random.uniform(kb, (fan_out,), jnp.float32, -bound, bound)
        if i < len(feats) - 1:  # hidden layer: + LayerNorm affine params
            g = jnp.ones((fan_out,), jnp.float32)
            beta = jnp.zeros((fan_out,), jnp.float32)
            params.append((W, b, g, beta))
        else:                   # output layer
            params.append((W, b))
    return params


def s_encoder_forward(data, params, *, block_b=2048, matmul_dtype=jnp.bfloat16):
    """data: (B, 1) int batch indices. Returns (B, dim_z * 2) float32.

    Note: on v5e prefer matmul_dtype=jnp.float32 (no native bf16 VPU; MXU gains
    nothing at these K/N sizes).
    """
    n_hidden = len(params) - 1
    n_batches = params[0][0].shape[1]      # W0 is (fan_out, n_batches)
    dim_out = params[-1][0].shape[0]
    B = data.shape[0]
    exact_recip = (jnp.dtype(matmul_dtype) == jnp.dtype(jnp.float32))

    # Batch tile lives on the LANE axis -> multiple of 128.
    Bp128 = _pad128(max(B, 1))
    tb = max(128, min(_round_up(block_b, 128), Bp128))
    # v7x megacore: prefer >= 2 grid blocks so both TensorCores get batch work.
    if Bp128 >= 256:
        tb = min(tb, _pad128((Bp128 + 1) // 2))
    num_blocks = pl.cdiv(B, tb)
    Bp = num_blocks * tb

    # Lane-dense index tiles: (num_blocks, 1, tb) int32.
    idx = data.reshape(-1).astype(jnp.int32)
    if Bp != B:
        idx = jnp.pad(idx, (0, Bp - B))    # padded rows computed, then dropped
    idx = idx.reshape(num_blocks, 1, tb)

    # Flatten args: streamed index tile first, then all parameters (resident).
    flat_args = [idx]
    in_specs = [pl.BlockSpec((1, 1, tb), lambda i: (i, 0, 0))]
    for li, layer in enumerate(params):
        for j, arr in enumerate(layer):
            if j == 0:
                # Layer-0 weight stays f32 (pure gather, exactness); others in matmul dtype.
                a = arr.astype(jnp.float32) if li == 0 else arr.astype(matmul_dtype)
            else:
                a = arr.reshape(-1, 1).astype(jnp.float32)      # (D, 1) lane-broadcastable
            flat_args.append(a)
            # Full-array block, same block index every step -> stays VMEM-resident.
            in_specs.append(pl.BlockSpec(a.shape, lambda i: (0, 0)))

    # --- VMEM budget (resident params + double-buffered I/O tiles + live activations) ---
    param_bytes = 0
    for li, layer in enumerate(params):
        for j, a in enumerate(layer):
            if j == 0:
                itemsize = 4 if li == 0 else jnp.dtype(matmul_dtype).itemsize
                param_bytes += _pad8(a.shape[0]) * _pad128(a.shape[1]) * itemsize
            else:
                param_bytes += _pad8(a.shape[0]) * 128 * 4
    widest = max([dim_out, n_batches] + [layer[0].shape[0] for layer in params])
    act_bytes = 4 * _pad8(widest) * tb * 4
    io_bytes = 2 * (tb * 4 + _pad8(dim_out) * tb * 4)
    try:
        vmem_cap = int(pltpu.get_tpu_info().vmem_capacity_bytes)
    except Exception:
        vmem_cap = 64 << 20
    vmem_hi = (vmem_cap * 3) // 4          # leave headroom (matters on v7x's 64 MiB)
    vmem_limit = int(min(max(2 * (param_bytes + act_bytes + io_bytes), 16 << 20), vmem_hi))

    # --- advisory cost estimate ---
    feats = [n_batches] + [layer[0].shape[0] for layer in params]
    flops = 0
    for i in range(1, len(params)):        # layer 0 is a gather, not a matmul
        flops += 2 * Bp * feats[i] * feats[i + 1]
    hidden_elems = Bp * sum(feats[1:-1])
    flops += 12 * hidden_elems             # LN + Mish elementwise
    transcendentals = 2 * hidden_elems     # exp + reciprocal per hidden element
    bytes_accessed = (Bp * 4 + Bp * dim_out * 4 +
                      sum(a.size * jnp.dtype(a.dtype).itemsize
                          for layer in params for a in layer))

    out = pl.pallas_call(
        _make_s_encoder_kernel(n_hidden, n_batches, matmul_dtype, exact_recip),
        out_shape=jax.ShapeDtypeStruct((dim_out, Bp), jnp.float32),
        grid_spec=pltpu.PrefetchScalarGridSpec(
            num_scalar_prefetch=0,
            grid=(num_blocks,),
            in_specs=in_specs,
            out_specs=pl.BlockSpec((dim_out, tb), lambda i: (0, i)),
        ),
        compiler_params=pltpu.CompilerParams(
            dimension_semantics=("parallel",),   # megacore split on v7x; no-op on v5e/v6e
            vmem_limit_bytes=vmem_limit,
        ),
        cost_estimate=pl.CostEstimate(
            flops=int(flops),
            transcendentals=int(transcendentals),
            bytes_accessed=int(bytes_accessed),
        ),
    )(*flat_args)

    # Kernel writes a lane-dense (dim_out, Bp) slab; transpose back in the wrapper.
    return out.T[:B]


def s_encoder_reference(data, params, n_batches, matmul_dtype=jnp.float32):
    """Plain-JAX reference (faithful to the PyTorch module; dtype-matched dots)."""
    x = jax.nn.one_hot(data[:, 0], n_batches, dtype=jnp.float32)
    n_hidden = len(params) - 1
    for li in range(n_hidden):
        W, b, g, beta = params[li]
        if li == 0:
            h = x @ W.T + b            # exact row selection in f32
        else:
            h = jnp.dot(x.astype(matmul_dtype), W.T.astype(matmul_dtype),
                        preferred_element_type=jnp.float32) + b
        mu = jnp.mean(h, axis=-1, keepdims=True)
        var = jnp.mean((h - mu) ** 2, axis=-1, keepdims=True)
        h = (h - mu) / jnp.sqrt(var + 1e-5) * g + beta
        x = h * jnp.tanh(jax.nn.softplus(h))
    W, b = params[-1]
    return jnp.dot(x.astype(matmul_dtype), W.T.astype(matmul_dtype),
                   preferred_element_type=jnp.float32) + b


if __name__ == "__main__":
    # Small but representative configuration.
    n_batches = 4
    dims_enc_s = [16, 32]
    dim_z = 8
    B = 300       # not a multiple of 128 -> exercises multi-block grid + padding path

    key = jax.random.PRNGKey(0)
    k_data, k_param = jax.random.split(key)

    data = jax.random.randint(k_data, (B, 1), 0, n_batches, dtype=jnp.int32)
    params = init_s_encoder_params(k_param, n_batches, dims_enc_s, dim_z)

    # f32 MXU path: tight check against the PyTorch-faithful reference (3 grid blocks).
    out_f32 = s_encoder_forward(data, params, block_b=128, matmul_dtype=jnp.float32)
    out_f32 = jax.block_until_ready(out_f32)
    ref_f32 = s_encoder_reference(data, params, n_batches, jnp.float32)
    assert out_f32.shape == (B, dim_z * 2), out_f32.shape
    assert jnp.allclose(out_f32, ref_f32, atol=1e-3, rtol=1e-3), "f32 mismatch vs reference"

    # bf16 MXU path (default for v6e/v7x): looser check vs bf16-dot reference (2 grid blocks).
    out_bf16 = s_encoder_forward(data, params, matmul_dtype=jnp.bfloat16)
    out_bf16 = jax.block_until_ready(out_bf16)
    ref_bf16 = s_encoder_reference(data, params, n_batches, jnp.bfloat16)
    assert out_bf16.shape == (B, dim_z * 2), out_bf16.shape
    assert jnp.allclose(out_bf16, ref_bf16, atol=2e-2, rtol=2e-2), "bf16 mismatch vs reference"

    print("KERNEL_OK")
</pallas_src>

<mosaic_0001>
module attributes {stable_mosaic.version = 11 : i64} {
  func.func @kernel(%arg0: i32, %arg1: memref<1x1x128xi32, #tpu.memory_space<vmem>>, %arg2: memref<16x4xf32, #tpu.memory_space<vmem>>, %arg3: memref<16x1xf32, #tpu.memory_space<vmem>>, %arg4: memref<16x1xf32, #tpu.memory_space<vmem>>, %arg5: memref<16x1xf32, #tpu.memory_space<vmem>>, %arg6: memref<32x16xf32, #tpu.memory_space<vmem>>, %arg7: memref<32x1xf32, #tpu.memory_space<vmem>>, %arg8: memref<32x1xf32, #tpu.memory_space<vmem>>, %arg9: memref<32x1xf32, #tpu.memory_space<vmem>>, %arg10: memref<16x32xf32, #tpu.memory_space<vmem>>, %arg11: memref<16x1xf32, #tpu.memory_space<vmem>>, %arg12: memref<16x128xf32, #tpu.memory_space<vmem>>) attributes {dimension_semantics = [#tpu.dimension_semantics<parallel>], iteration_bounds = array<i64: 3>, scalar_prefetch = 0 : i64, scratch_operands = 0 : i64, tpu.core_type = #tpu.core_type<tc>, window_params = [{transform_indices = @transform_0, window_bounds = array<i64: 1, 1, 128>}, {pipeline_mode = #tpu.pipeline_mode<synchronous>, transform_indices = @transform_1, window_bounds = array<i64: 16, 4>}, {pipeline_mode = #tpu.pipeline_mode<synchronous>, transform_indices = @transform_2, window_bounds = array<i64: 16, 1>}, {pipeline_mode = #tpu.pipeline_mode<synchronous>, transform_indices = @transform_3, window_bounds = array<i64: 16, 1>}, {pipeline_mode = #tpu.pipeline_mode<synchronous>, transform_indices = @transform_4, window_bounds = array<i64: 16, 1>}, {pipeline_mode = #tpu.pipeline_mode<synchronous>, transform_indices = @transform_5, window_bounds = array<i64: 32, 16>}, {pipeline_mode = #tpu.pipeline_mode<synchronous>, transform_indices = @transform_6, window_bounds = array<i64: 32, 1>}, {pipeline_mode = #tpu.pipeline_mode<synchronous>, transform_indices = @transform_7, window_bounds = array<i64: 32, 1>}, {pipeline_mode = #tpu.pipeline_mode<synchronous>, transform_indices = @transform_8, window_bounds = array<i64: 32, 1>}, {pipeline_mode = #tpu.pipeline_mode<synchronous>, transform_indices = @transform_9, window_bounds = array<i64: 16, 32>}, {pipeline_mode = #tpu.pipeline_mode<synchronous>, transform_indices = @transform_10, window_bounds = array<i64: 16, 1>}, {transform_indices = @transform_11, window_bounds = array<i64: 16, 128>}]} {
    %c0 = arith.constant 0 : index
    %c0_0 = arith.constant 0 : index
    %c0_1 = arith.constant 0 : index
    %0 = vector.load %arg1[%c0, %c0_0, %c0_1] : memref<1x1x128xi32, #tpu.memory_space<vmem>>, vector<1x1x128xi32>
    %1 = vector.shape_cast %0 : vector<1x1x128xi32> to vector<1x128xi32>
    %c0_2 = arith.constant 0 : index
    %c0_3 = arith.constant 0 : index
    %2 = vector.load %arg2[%c0_2, %c0_3] : memref<16x4xf32, #tpu.memory_space<vmem>>, vector<16x4xf32>
    %c0_4 = arith.constant 0 : index
    %c0_5 = arith.constant 0 : index
    %3 = vector.load %arg3[%c0_4, %c0_5] : memref<16x1xf32, #tpu.memory_space<vmem>>, vector<16x1xf32>
    %4 = vector.shape_cast %3 : vector<16x1xf32> to vector<16x1xf32>
    %5 = vector.broadcast %4 : vector<16x1xf32> to vector<16x128xf32>
    %c0_i32 = arith.constant 0 : i32
    %6 = vector.broadcast %c0_i32 : i32 to vector<1x128xi32>
    %7 = arith.cmpi eq, %1, %6 : vector<1x128xi32>
    %8 = arith.extui %7 : vector<1x128xi1> to vector<1x128xi32>
    %9 = arith.sitofp %8 : vector<1x128xi32> to vector<1x128xf32>
    %10 = vector.extract_strided_slice %2 {offsets = [0, 0], sizes = [16, 1], strides = [1, 1]} : vector<16x4xf32> to vector<16x1xf32>
    %11 = vector.broadcast %10 : vector<16x1xf32> to vector<16x128xf32>
    %12 = vector.broadcast %9 : vector<1x128xf32> to vector<16x128xf32>
    %13 = arith.mulf %11, %12 : vector<16x128xf32>
    %14 = arith.addf %5, %13 : vector<16x128xf32>
    %c1_i32 = arith.constant 1 : i32
    %15 = vector.broadcast %c1_i32 : i32 to vector<1x128xi32>
    %16 = arith.cmpi eq, %1, %15 : vector<1x128xi32>
    %17 = arith.extui %16 : vector<1x128xi1> to vector<1x128xi32>
    %18 = arith.sitofp %17 : vector<1x128xi32> to vector<1x128xf32>
    %19 = vector.extract_strided_slice %2 {offsets = [0, 1], sizes = [16, 1], strides = [1, 1]} : vector<16x4xf32> to vector<16x1xf32>
    %20 = vector.broadcast %19 : vector<16x1xf32> to vector<16x128xf32>
    %21 = vector.broadcast %18 : vector<1x128xf32> to vector<16x128xf32>
    %22 = arith.mulf %20, %21 : vector<16x128xf32>
    %23 = arith.addf %14, %22 : vector<16x128xf32>
    %c2_i32 = arith.constant 2 : i32
    %24 = vector.broadcast %c2_i32 : i32 to vector<1x128xi32>
    %25 = arith.cmpi eq, %1, %24 : vector<1x128xi32>
    %26 = arith.extui %25 : vector<1x128xi1> to vector<1x128xi32>
    %27 = arith.sitofp %26 : vector<1x128xi32> to vector<1x128xf32>
    %28 = vector.extract_strided_slice %2 {offsets = [0, 2], sizes = [16, 1], strides = [1, 1]} : vector<16x4xf32> to vector<16x1xf32>
    %29 = vector.broadcast %28 : vector<16x1xf32> to vector<16x128xf32>
    %30 = vector.broadcast %27 : vector<1x128xf32> to vector<16x128xf32>
    %31 = arith.mulf %29, %30 : vector<16x128xf32>
    %32 = arith.addf %23, %31 : vector<16x128xf32>
    %c3_i32 = arith.constant 3 : i32
    %33 = vector.broadcast %c3_i32 : i32 to vector<1x128xi32>
    %34 = arith.cmpi eq, %1, %33 : vector<1x128xi32>
    %35 = arith.extui %34 : vector<1x128xi1> to vector<1x128xi32>
    %36 = arith.sitofp %35 : vector<1x128xi32> to vector<1x128xf32>
    %37 = vector.extract_strided_slice %2 {offsets = [0, 3], sizes = [16, 1], strides = [1, 1]} : vector<16x4xf32> to vector<16x1xf32>
    %38 = vector.broadcast %37 : vector<16x1xf32> to vector<16x128xf32>
    %39 = vector.broadcast %36 : vector<1x128xf32> to vector<16x128xf32>
    %40 = arith.mulf %38, %39 : vector<16x128xf32>
    %41 = arith.addf %32, %40 : vector<16x128xf32>
    %cst = arith.constant dense<0.000000e+00> : vector<128xf32>
    %42 = vector.multi_reduction <add>, %41, %cst [0] : vector<16x128xf32> to vector<128xf32>
    %43 = vector.shape_cast %42 : vector<128xf32> to vector<1x128xf32>
    %cst_6 = arith.constant 1.600000e+01 : f32
    %44 = vector.broadcast %cst_6 : f32 to vector<1x128xf32>
    %45 = arith.divf %43, %44 : vector<1x128xf32>
    %46 = vector.broadcast %45 : vector<1x128xf32> to vector<16x128xf32>
    %47 = arith.subf %41, %46 : vector<16x128xf32>
    %48 = arith.mulf %47, %47 : vector<16x128xf32>
    %cst_7 = arith.constant dense<0.000000e+00> : vector<128xf32>
    %49 = vector.multi_reduction <add>, %48, %cst_7 [0] : vector<16x128xf32> to vector<128xf32>
    %50 = vector.shape_cast %49 : vector<128xf32> to vector<1x128xf32>
    %cst_8 = arith.constant 1.600000e+01 : f32
    %51 = vector.broadcast %cst_8 : f32 to vector<1x128xf32>
    %52 = arith.divf %50, %51 : vector<1x128xf32>
    %cst_9 = arith.constant 9.99999974E-6 : f32
    %53 = vector.broadcast %cst_9 : f32 to vector<1x128xf32>
    %54 = arith.addf %52, %53 : vector<1x128xf32>
    %55 = math.rsqrt %54 : vector<1x128xf32>
    %56 = vector.broadcast %55 : vector<1x128xf32> to vector<16x128xf32>
    %57 = arith.mulf %47, %56 : vector<16x128xf32>
    %c0_10 = arith.constant 0 : index
    %c0_11 = arith.constant 0 : index
    %58 = vector.load %arg4[%c0_10, %c0_11] : memref<16x1xf32, #tpu.memory_space<vmem>>, vector<16x1xf32>
    %59 = vector.broadcast %58 : vector<16x1xf32> to vector<16x128xf32>
    %60 = arith.mulf %57, %59 : vector<16x128xf32>
    %c0_12 = arith.constant 0 : index
    %c0_13 = arith.constant 0 : index
    %61 = vector.load %arg5[%c0_12, %c0_13] : memref<16x1xf32, #tpu.memory_space<vmem>>, vector<16x1xf32>
    %62 = vector.broadcast %61 : vector<16x1xf32> to vector<16x128xf32>
    %63 = arith.addf %60, %62 : vector<16x128xf32>
    %64 = math.exp %63 : vector<16x128xf32>
    %cst_14 = arith.constant 1.000000e+00 : f32
    %65 = vector.broadcast %cst_14 : f32 to vector<16x128xf32>
    %66 = arith.addf %65, %64 : vector<16x128xf32>
    %67 = arith.mulf %66, %66 : vector<16x128xf32>
    %cst_15 = arith.constant 1.000000e+00 : f32
    %68 = vector.broadcast %cst_15 : f32 to vector<16x128xf32>
    %69 = arith.addf %67, %68 : vector<16x128xf32>
    %cst_16 = arith.constant 2.000000e+00 : f32
    %70 = vector.broadcast %cst_16 : f32 to vector<16x128xf32>
    %71 = arith.divf %70, %69 : vector<16x128xf32>
    %cst_17 = arith.constant 1.000000e+00 : f32
    %72 = vector.broadcast %cst_17 : f32 to vector<16x128xf32>
    %73 = arith.subf %72, %71 : vector<16x128xf32>
    %74 = arith.mulf %63, %73 : vector<16x128xf32>
    %c0_18 = arith.constant 0 : index
    %c0_19 = arith.constant 0 : index
    %75 = vector.load %arg6[%c0_18, %c0_19] : memref<32x16xf32, #tpu.memory_space<vmem>>, vector<32x16xf32>
    %cst_20 = arith.constant dense<0.000000e+00> : vector<32x128xf32>
    %76 = tpu.matmul %75, %74, %cst_20 {dimension_numbers = #tpu.dot_dimension_numbers<[1], [0], [0], [1], [0, 0, 1, 1], [], []>} : vector<32x16xf32>, vector<16x128xf32>, vector<32x128xf32> -> vector<32x128xf32>
    %c0_21 = arith.constant 0 : index
    %c0_22 = arith.constant 0 : index
    %77 = vector.load %arg7[%c0_21, %c0_22] : memref<32x1xf32, #tpu.memory_space<vmem>>, vector<32x1xf32>
    %78 = vector.broadcast %77 : vector<32x1xf32> to vector<32x128xf32>
    %79 = arith.addf %76, %78 : vector<32x128xf32>
    %cst_23 = arith.constant dense<0.000000e+00> : vector<128xf32>
    %80 = vector.multi_reduction <add>, %79, %cst_23 [0] : vector<32x128xf32> to vector<128xf32>
    %81 = vector.shape_cast %80 : vector<128xf32> to vector<1x128xf32>
    %cst_24 = arith.constant 3.200000e+01 : f32
    %82 = vector.broadcast %cst_24 : f32 to vector<1x128xf32>
    %83 = arith.divf %81, %82 : vector<1x128xf32>
    %84 = vector.broadcast %83 : vector<1x128xf32> to vector<32x128xf32>
    %85 = arith.subf %79, %84 : vector<32x128xf32>
    %86 = arith.mulf %85, %85 : vector<32x128xf32>
    %cst_25 = arith.constant dense<0.000000e+00> : vector<128xf32>
    %87 = vector.multi_reduction <add>, %86, %cst_25 [0] : vector<32x128xf32> to vector<128xf32>
    %88 = vector.shape_cast %87 : vector<128xf32> to vector<1x128xf32>
    %cst_26 = arith.constant 3.200000e+01 : f32
    %89 = vector.broadcast %cst_26 : f32 to vector<1x128xf32>
    %90 = arith.divf %88, %89 : vector<1x128xf32>
    %cst_27 = arith.constant 9.99999974E-6 : f32
    %91 = vector.broadcast %cst_27 : f32 to vector<1x128xf32>
    %92 = arith.addf %90, %91 : vector<1x128xf32>
    %93 = math.rsqrt %92 : vector<1x128xf32>
    %94 = vector.broadcast %93 : vector<1x128xf32> to vector<32x128xf32>
    %95 = arith.mulf %85, %94 : vector<32x128xf32>
    %c0_28 = arith.constant 0 : index
    %c0_29 = arith.constant 0 : index
    %96 = vector.load %arg8[%c0_28, %c0_29] : memref<32x1xf32, #tpu.memory_space<vmem>>, vector<32x1xf32>
    %97 = vector.broadcast %96 : vector<32x1xf32> to vector<32x128xf32>
    %98 = arith.mulf %95, %97 : vector<32x128xf32>
    %c0_30 = arith.constant 0 : index
    %c0_31 = arith.constant 0 : index
    %99 = vector.load %arg9[%c0_30, %c0_31] : memref<32x1xf32, #tpu.memory_space<vmem>>, vector<32x1xf32>
    %100 = vector.broadcast %99 : vector<32x1xf32> to vector<32x128xf32>
    %101 = arith.addf %98, %100 : vector<32x128xf32>
    %102 = math.exp %101 : vector<32x128xf32>
    %cst_32 = arith.constant 1.000000e+00 : f32
    %103 = vector.broadcast %cst_32 : f32 to vector<32x128xf32>
    %104 = arith.addf %103, %102 : vector<32x128xf32>
    %105 = arith.mulf %104, %104 : vector<32x128xf32>
    %cst_33 = arith.constant 1.000000e+00 : f32
    %106 = vector.broadcast %cst_33 : f32 to vector<32x128xf32>
    %107 = arith.addf %105, %106 : vector<32x128xf32>
    %cst_34 = arith.constant 2.000000e+00 : f32
    %108 = vector.broadcast %cst_34 : f32 to vector<32x128xf32>
    %109 = arith.divf %108, %107 : vector<32x128xf32>
    %cst_35 = arith.constant 1.000000e+00 : f32
    %110 = vector.broadcast %cst_35 : f32 to vector<32x128xf32>
    %111 = arith.subf %110, %109 : vector<32x128xf32>
    %112 = arith.mulf %101, %111 : vector<32x128xf32>
    %c0_36 = arith.constant 0 : index
    %c0_37 = arith.constant 0 : index
    %113 = vector.load %arg10[%c0_36, %c0_37] : memref<16x32xf32, #tpu.memory_space<vmem>>, vector<16x32xf32>
    %cst_38 = arith.constant dense<0.000000e+00> : vector<16x128xf32>
    %114 = tpu.matmul %113, %112, %cst_38 {dimension_numbers = #tpu.dot_dimension_numbers<[1], [0], [0], [1], [0, 0, 1, 1], [], []>} : vector<16x32xf32>, vector<32x128xf32>, vector<16x128xf32> -> vector<16x128xf32>
    %c0_39 = arith.constant 0 : index
    %c0_40 = arith.constant 0 : index
    %115 = vector.load %arg11[%c0_39, %c0_40] : memref<16x1xf32, #tpu.memory_space<vmem>>, vector<16x1xf32>
    %116 = vector.broadcast %115 : vector<16x1xf32> to vector<16x128xf32>
    %117 = arith.addf %114, %116 : vector<16x128xf32>
    %c0_41 = arith.constant 0 : index
    %c0_42 = arith.constant 0 : index
    %118 = vector.load %arg12[%c0_41, %c0_42] : memref<16x128xf32, #tpu.memory_space<vmem>>, vector<16x128xf32>
    tpu.vector_store %arg12[%c0_41, %c0_42], %117 {strides = array<i32>} : memref<16x128xf32, #tpu.memory_space<vmem>>, vector<16x128xf32>,
    return
  }
  func.func @transform_0(%arg0: i32) -> (i32, i32, i32) {
    %c0_i32 = arith.constant 0 : i32
    %c0_i32_0 = arith.constant 0 : i32
    %c0_i32_1 = arith.constant 0 : i32
    return %arg0, %c0_i32, %c0_i32_0 : i32, i32, i32
  }
  func.func @transform_1(%arg0: i32) -> (i32, i32) {
    %c0_i32 = arith.constant 0 : i32
    %c0_i32_0 = arith.constant 0 : i32
    %c0_i32_1 = arith.constant 0 : i32
    return %c0_i32, %c0_i32_0 : i32, i32
  }
  func.func @transform_2(%arg0: i32) -> (i32, i32) {
    %c0_i32 = arith.constant 0 : i32
    %c0_i32_0 = arith.constant 0 : i32
    %c0_i32_1 = arith.constant 0 : i32
    return %c0_i32, %c0_i32_0 : i32, i32
  }
  func.func @transform_3(%arg0: i32) -> (i32, i32) {
    %c0_i32 = arith.constant 0 : i32
    %c0_i32_0 = arith.constant 0 : i32
    %c0_i32_1 = arith.constant 0 : i32
    return %c0_i32, %c0_i32_0 : i32, i32
  }
  func.func @transform_4(%arg0: i32) -> (i32, i32) {
    %c0_i32 = arith.constant 0 : i32
    %c0_i32_0 = arith.constant 0 : i32
    %c0_i32_1 = arith.constant 0 : i32
    return %c0_i32, %c0_i32_0 : i32, i32
  }
  func.func @transform_5(%arg0: i32) -> (i32, i32) {
    %c0_i32 = arith.constant 0 : i32
    %c0_i32_0 = arith.constant 0 : i32
    %c0_i32_1 = arith.constant 0 : i32
    return %c0_i32, %c0_i32_0 : i32, i32
  }
  func.func @transform_6(%arg0: i32) -> (i32, i32) {
    %c0_i32 = arith.constant 0 : i32
    %c0_i32_0 = arith.constant 0 : i32
    %c0_i32_1 = arith.constant 0 : i32
    return %c0_i32, %c0_i32_0 : i32, i32
  }
  func.func @transform_7(%arg0: i32) -> (i32, i32) {
    %c0_i32 = arith.constant 0 : i32
    %c0_i32_0 = arith.constant 0 : i32
    %c0_i32_1 = arith.constant 0 : i32
    return %c0_i32, %c0_i32_0 : i32, i32
  }
  func.func @transform_8(%arg0: i32) -> (i32, i32) {
    %c0_i32 = arith.constant 0 : i32
    %c0_i32_0 = arith.constant 0 : i32
    %c0_i32_1 = arith.constant 0 : i32
    return %c0_i32, %c0_i32_0 : i32, i32
  }
  func.func @transform_9(%arg0: i32) -> (i32, i32) {
    %c0_i32 = arith.constant 0 : i32
    %c0_i32_0 = arith.constant 0 : i32
    %c0_i32_1 = arith.constant 0 : i32
    return %c0_i32, %c0_i32_0 : i32, i32
  }
  func.func @transform_10(%arg0: i32) -> (i32, i32) {
    %c0_i32 = arith.constant 0 : i32
    %c0_i32_0 = arith.constant 0 : i32
    %c0_i32_1 = arith.constant 0 : i32
    return %c0_i32, %c0_i32_0 : i32, i32
  }
  func.func @transform_11(%arg0: i32) -> (i32, i32) {
    %c0_i32 = arith.constant 0 : i32
    %c0_i32_0 = arith.constant 0 : i32
    return %c0_i32, %arg0 : i32, i32
  }
}

</mosaic_0001>

<bundles_post_ra>
// kernel: tpu_custom_call.1
= control target key start
LH: loop header
LB: loop body
LE: loop exit
PB: predicated region body
PF: predicated region fallthrough
CT: control target
= control target key end

     0   :  { %s1448_s0 = inlined_call_operand.vmem [shape: s32[3,1,128], index: 0, kind: input, shape index: {}]   ;;  %s1449_s1 = inlined_call_operand.vmem [shape: f32[16,4], index: 1, kind: input, shape index: {}]   ;;  %s1450_s2 = inlined_call_operand.vmem [shape: f32[16,1], index: 2, kind: input, shape index: {}]   ;;  %s1451_s3 = inlined_call_operand.vmem [shape: f32[16,1], index: 3, kind: input, shape index: {}]   ;;  %s1452_s4 = inlined_call_operand.vmem [shape: f32[16,1], index: 4, kind: input, shape index: {}]   ;;  %s1453_s5 = inlined_call_operand.vmem [shape: f32[32,16], index: 5, kind: input, shape index: {}]   ;;  %s1454_s6 = inlined_call_operand.vmem [shape: f32[32,1], index: 6, kind: input, shape index: {}]   ;;  %s1455_s7 = inlined_call_operand.vmem [shape: f32[32,1], index: 7, kind: input, shape index: {}]   ;;  %s1456_s8 = inlined_call_operand.vmem [shape: f32[32,1], index: 8, kind: input, shape index: {}]   ;;  %s1457_s9 = inlined_call_operand.vmem [shape: f32[16,32], index: 9, kind: input, shape index: {}]   ;;  %s1458_s10 = inlined_call_operand.vmem [shape: f32[16,1], index: 10, kind: input, shape index: {}]   ;;  %s1459_s11 = inlined_call_operand.hbm [shape: f32[16,384], index: 11, kind: output, shape index: {}]  }
   0x1   :  { %1460 = sst [smem:[#allocation5_spill]] %s1448_s0 }
   0x2   :  { %16 = vsyncpa [#allocation3], 0 }
   0x3   :  { %18 = vsyncpa [#allocation3 + $0x1], 0  ;;  %s1255_s17 = smov 0   ;;  %s1257_s18 = smov 0  }
   0x4   :  { %s1259_s19 = smov 0   ;;  %s1261_s20 = smov 0  }
   0x5 LB: > { %s1276_s21 = sadd.s32 4294967295, %s1184_s20   ;;  %s974_s22 = sadd.s32 4294967294, %s1184_s20   ;;  %s1184_s20 = sphi %s1261_s20, %s1467_s20   ;;  %s1180_s19 = sphi %s1259_s19, %s1466_s19   ;;  %s1176_s18 = sphi %s1257_s18, %s1465_s18   ;;  %s1172_s17 = sphi %s1255_s17, %s1464_s17  }
   0x6   : > { %s1280_s23 = sadd.s32 1, %s1184_s20   ;;  %s267_s24 = sadd.s32 1, %s1180_s19 }
   0x7   : > { %s264_s25 = ssub.s32 %s1184_s20, %s1280_s23  ;;  %p277_p0 = scmp.ne.s32.totalorder %s1180_s19, %s1176_s18 }
   0x8   : > { %p265_p1 = scmp.eq.s32.totalorder %s264_s25, 0  ;;  %p278_p2 = scmp.eq.s32.totalorder %s1276_s21, 2 }
   0x9   : > { %p283_p3 = scmp.ne.s32.totalorder %s1176_s18, %s1172_s17  ;;  %p284_p4 = scmp.eq.s32.totalorder %s974_s22, 2 }
   0xa   : > { %s1291_s26 = scalar_select %p265_p1, %s1180_s19, %s267_s24  }
   0xb   : > { %p1293_p5 = por %p278_p2, %p277_p0  ;;  %p1297_p6 = por %p284_p4, %p283_p3 }
   0xc   : > { %p977_p7 = scmp.ge.s32.totalorder %s1184_s20, 1  ;;  %p338_p8 = scmp.lt.s32.totalorder %s1184_s20, 4 }
   0xe   : > { %p339_p9 = pnand %p977_p7, %p338_p8 }
   0xf   : > { %v382_v0 = vld [vmem:[%s1450_s2] sm:$0xff] (!%p339_p9)  ;;  %v1186_v2 = vmov (!%p339_p9), 0   ;;  %v383_v3 = vld [vmem:[%s1450_s2 + $0x8] sm:$0xff] (!%p339_p9)  ;;  %v1187_v5 = vmov (!%p339_p9), 1   ;;  %v1188_v6 = vmov (!%p339_p9), 2   ;;  %v1189_v8 = vmov (!%p339_p9), 3  }
  0x10   : > { %342 = sbr.rel (%p339_p9) target bundleno = 828 (0x33c), region = 64  ;;  %v380_v1 = vld [vmem:[%s1449_s1] sm:$0xff] (!%p339_p9)  ;;  %1086 = vset.pattern.permute.xlu1 (!%p339_p9), %v1186_v2  ;;  %1085 = vset.pattern.permute.xlu0 (!%p339_p9), %v1186_v2  ;;  %v381_v4 = vld [vmem:[%s1449_s1 + $0x8] sm:$0xff] (!%p339_p9)  ;;  %v558_v12 = vld [vmem:[%s1454_s6 + $0x18] sm:$0xff] (!%p339_p9)  ;;  %p376_p10 = scmp.lt.s32.totalorder (!%p339_p9), %s1276_s21, 2  ;;  %vm579_vm0 = vcmask (!%p339_p9), 130048   ;;  %v408_v28 = vlaneseq (!%p339_p9) }
  0x11   : > { %386 = vperm.xlu1 (!%p339_p9), %1086, %v382_v0   ;;  %399 = vperm.xlu0 (!%p339_p9), %1085, %v380_v1   ;;  %v505_v7 = vld [vmem:[%s1451_s3] sm:$0xff] (!%p339_p9)  ;;  %v520_v9 = vld [vmem:[%s1452_s4 + $0x8] sm:$0xff] (!%p339_p9)  ;;  %v557_v17 = vld [vmem:[%s1454_s6 + $0x10] sm:$0xff] (!%p339_p9)  ;;  %s1463_s0 = sld [smem:[#allocation5_spill]] (!%p339_p9)  ;;  %v1190_v35 = vmov (!%p339_p9), 0.0   ;;  %vm818_vm5 = vcmask (!%p339_p9), 261120  }
  0x12   : > { %v556_v10 = vld [vmem:[%s1454_s6 + $0x8] sm:$0xff] (!%p339_p9)  ;;  %v519_v13 = vld [vmem:[%s1452_s4] sm:$0xff] (!%p339_p9)  ;;  %v715_v18 = vld [vmem:[%s1455_s7 + $0x18] sm:$0xff] (!%p339_p9)  ;;  %v409_v31 = vshrl.u32 (!%p339_p9), %v408_v28, 7  ;;  %s373_s29 = sand.u32 (!%p339_p9), 1, %s1176_s18   ;;  %s990_s14 = sshll.u32 (!%p339_p9), %s1276_s21, 7 }
  0x13   : > { %v506_v11 = vld [vmem:[%s1451_s3 + $0x8] sm:$0xff] (!%p339_p9)  ;;  %v555_v15 = vld [vmem:[%s1454_s6] sm:$0xff] (!%p339_p9)  ;;  %v743_v20 = vld [vmem:[%s1456_s8 + $0x18] sm:$0xff] (!%p339_p9)  ;;  %s978_s30 = sshll.u32 (!%p339_p9), %s373_s29, 4  ;;  %s1405_s22 = scalar_lea.hbm (!%p339_p9), %s1459_s11, %s990_s14 }
  0x14   : > { %v713_v14 = vld [vmem:[%s1455_s7 + $0x8] sm:$0xff] (!%p339_p9)  ;;  %v712_v19 = vld [vmem:[%s1455_s7] sm:$0xff] (!%p339_p9)  ;;  %v714_v23 = vld [vmem:[%s1455_s7 + $0x10] sm:$0xff] (!%p339_p9)  ;;  %v410_v34 = vsub.s32 (!%p339_p9), 0, %v409_v31  ;;  %s375_s12 = scalar_lea.vmem (!%p339_p9), [#allocation2], %s978_s30  ;;  %s1407_s24 = scalar_lea.sflag (!%p339_p9), [#allocation3], %s373_s29 }
  0x15   : > { %391 = vperm.xlu1 (!%p339_p9), %1086, %v383_v3   ;;  %404 = vperm.xlu0 (!%p339_p9), %1085, %v381_v4   ;;  %v741_v16 = vld [vmem:[%s1456_s8 + $0x8] sm:$0xff] (!%p339_p9)  ;;  %v740_v21 = vld [vmem:[%s1456_s8] sm:$0xff] (!%p339_p9)  ;;  %v742_v24 = vld [vmem:[%s1456_s8 + $0x10] sm:$0xff] (!%p339_p9)  ;;  %s915_s13 = sshll.u32 (!%p339_p9), %s375_s12, 4  ;;  %s1400_s13 = int_to_ptr.vmem [resolvable:$true] %s915_s13 }
  0x16   : > { %v807_v22 = vld [vmem:[%s1458_s10 + $0x8] sm:$0xff] (!%p339_p9)  ;;  %v806_v25 = vld [vmem:[%s1458_s10] sm:$0xff] (!%p339_p9) }
  0x17   : > { %v551_v26 = vld [vmem:[%s1453_s5] sm:$0xff]  ;;  %s377_s16 = scalar_select %p376_p10, %s1276_s21, 2 }
  0x18   : > { %1009 = vmatprep.mubr.msk.f32.mxu0 %vm579_vm0, %v551_v26  ;;  %s1122_s21 = scalar_lea.vmem %s1400_s13, 256 }
  0x19   : > { %1088 = vset.pattern.permute.xlu1 %v1187_v5  ;;  %1087 = vset.pattern.permute.xlu0 %v1187_v5  ;;  %s378_s25 = scalar_lea.vmem %s1463_s0, %s377_s16  ;;  %p1123_p11 = scmp.ne.s32.totalorder %s1400_s13, %s1122_s21 }
  0x1a   : > { %425 = vperm.xlu1 %1088, %v381_v4   ;;  %421 = vperm.xlu0 %1087, %v380_v1   ;;  %v379_v30 = vld [vmem:[%s378_s25] sm:$0x1]  ;;  %s1191_s25 = smov [#allocation2]  }
  0x1b   : > { %vm394_vm1 = vcmp.eq.s32.totalorder %v379_v30, 0  ;;  %vm417_vm2 = vcmp.eq.s32.totalorder %v379_v30, 1  ;;  %vm438_vm3 = vcmp.eq.s32.totalorder %v379_v30, 2  ;;  %vm459_vm4 = vcmp.eq.s32.totalorder %v379_v30, 3  ;;  %p1124_p12 = pnand %p1123_p11, %p1293_p5  ;;  %s1126_s30 = sshll.u32 %s1191_s25, 4  ;;  %s1127_s30 = int_to_ptr.vmem [resolvable:$false] %s1126_s30 }
  0x1c   : > { %v979_v36 = vsel %vm394_vm1, 1.0, %v1190_v35  ;;  %v980_v38 = vsel %vm417_vm2, 1.0, %v1190_v35  ;;  %v981_v41 = vsel %vm438_vm3, 1.0, %v1190_v35  ;;  %v982_v44 = vsel %vm459_vm4, 1.0, %v1190_v35  ;;  %s1128_s0 = scalar_lea.vmem %s1127_s30, 512  ;;  %p1129_p0 = scmp.lt.s32.totalorder %s1400_s13, %s1127_s30 }
  0x1d   : > { %v411_v40 = vrot.slane %v979_v36, %v410_v34  ;;  %v432_v42 = vrot.slane %v980_v38, %v410_v34  ;;  %v453_v47 = vrot.slane %v981_v41, %v410_v34  ;;  %v474_v51 = vrot.slane %v982_v44, %v410_v34  ;;  %p1125_p13 = pneg %p1124_p12  ;;  %p1130_p1 = scmp.lt.s32.totalorder %s1128_s0, %s1122_s21 }
  0x1e   : > { %1089 = vset.pattern.permute.xlu1 %v1188_v6  ;;  %1090 = vset.pattern.permute.xlu0 %v1188_v6 }
  0x1f   : > { %442 = vperm.xlu1 %1089, %v380_v1   ;;  %446 = vperm.xlu0 %1090, %v381_v4   ;;  %p1131_p2 = por %p1130_p1, %p1129_p0 }
  0x21   : > { %p1132_p3 = pnand %p1131_p2, %p1125_p13 }
  0x23   : > { %1091 = vset.pattern.permute.xlu1 %v1189_v8  ;;  %1092 = vset.pattern.permute.xlu0 %v1186_v2 }
  0x24   : > { %463 = vperm.xlu1 %1091, %v380_v1   ;;  %509 = vperm.xlu0 %1092, %v505_v7  }
  0x28   : > { %467 = vperm.xlu1 %1091, %v381_v4   ;;  %528 = vperm.xlu0 %1092, %v520_v9  }
  0x2c   : > { %1093 = vset.pattern.permute.xlu1 %v1186_v2  ;;  %566 = vperm.xlu0 %1092, %v556_v10  }
  0x2d   : > { %514 = vperm.xlu1 %1093, %v506_v11  }
  0x30   : > { %576 = vperm.xlu0 %1092, %v558_v12  }
  0x31   : > { %523 = vperm.xlu1 %1093, %v519_v13  }
  0x34   : > { %723 = vperm.xlu0 %1092, %v713_v14  }
  0x35   : > { %561 = vperm.xlu1 %1093, %v555_v15  }
  0x38   : > { %751 = vperm.xlu0 %1092, %v741_v16  }
  0x39   : > { %571 = vperm.xlu1 %1093, %v557_v17  }
  0x3c   : > { %733 = vperm.xlu0 %1092, %v715_v18  }
  0x3d   : > { %718 = vperm.xlu1 %1093, %v712_v19  }
  0x40   : > { %761 = vperm.xlu0 %1092, %v743_v20  }
  0x41   : > { %746 = vperm.xlu1 %1093, %v740_v21  }
  0x44   : > { %815 = vperm.xlu0 %1092, %v807_v22  }
  0x45   : > { %728 = vperm.xlu1 %1093, %v714_v23  }
  0x49   : > { %756 = vperm.xlu1 %1093, %v742_v24  }
  0x4d   : > { %810 = vperm.xlu1 %1093, %v806_v25  }
  0x90   : > { %v387_v27 = vpop.permute.xlu1 %386  ;;  %v400_v29 = vpop.permute.xlu0 %399 }
  0x91   : > { %v413_v45 = vmul.f32 %v411_v40, %v400_v29 }
  0x93   : > { %v415_v53 = vadd.f32 %v413_v45, %v387_v27 }
  0x94   : > { %v392_v32 = vpop.permute.xlu1 %391  ;;  %v405_v33 = vpop.permute.xlu0 %404 }
  0x95   : > { %v414_v46 = vmul.f32 %v411_v40, %v405_v33 }
  0x97   : > { %v416_v54 = vadd.f32 %v414_v46, %v392_v32 }
  0x99   : > { %v426_v37 = vpop.permute.xlu1 %425  ;;  %v422_v39 = vpop.permute.xlu0 %421 }
  0x9a   : > { %v435_v49 = vmul.f32 %v432_v42, %v426_v37  ;;  %v434_v50 = vmul.f32 %v432_v42, %v422_v39 }
  0x9c   : > { %v437_v57 = vadd.f32 %v435_v49, %v416_v54  ;;  %v436_v58 = vadd.f32 %v434_v50, %v415_v53  ;;  %v552_v53 = vld [vmem:[%s1453_s5 + $0x8] sm:$0xff]  ;;  %v553_v54 = vld [vmem:[%s1453_s5 + $0x10] sm:$0xff] }
  0x9e   : > { %v443_v43 = vpop.permute.xlu1 %442  ;;  %v447_v48 = vpop.permute.xlu0 %446 }
  0x9f   : > { %v455_v55 = vmul.f32 %v453_v47, %v443_v43  ;;  %v456_v56 = vmul.f32 %v453_v47, %v447_v48 }
  0xa1   : > { %v457_v61 = vadd.f32 %v455_v55, %v436_v58  ;;  %v458_v62 = vadd.f32 %v456_v56, %v437_v57  ;;  %v554_v55 = vld [vmem:[%s1453_s5 + $0x18] sm:$0xff]  ;;  %v804_v56 = vld [vmem:[%s1457_s9] sm:$0xff] }
  0xa2   : > { %1023 = vmatprep.mubr.msk.f32.mxu1 %vm818_vm5, %v804_v56 }
  0xa3   : > { %v464_v52 = vpop.permute.xlu1 %463  ;;  %v510_v24 = vpop.permute.xlu0 %509 }
  0xa4   : > { %v476_v59 = vmul.f32 %v474_v51, %v464_v52 }
  0xa6   : > { %v478_v0 = vadd.f32 %v476_v59, %v457_v61 }
  0xa7   : > { %v468_v60 = vpop.permute.xlu1 %467  ;;  %v529_v31 = vpop.permute.xlu0 %528 }
  0xa8   : > { %v477_v63 = vmul.f32 %v474_v51, %v468_v60 }
  0xaa   : > { %v479_v1 = vadd.f32 %v477_v63, %v458_v62 }
  0xab   : > { %v567_v58 = vpop.permute.xlu0 %566 }
  0xac   : > { %v480_v2 = vadd.f32 %v479_v1, %v478_v0  ;;  %v515_v23 = vpop.permute.xlu1 %514 }
  0xae   : > { %v481_v3 = vrot.slane %v480_v2, 4 }
  0xb0   : > { %v482_v4 = vadd.f32 %v481_v3, %v480_v2  ;;  %v524_v30 = vpop.permute.xlu1 %523 }
  0xb2   : > { %v483_v5 = vrot.slane %v482_v4, 2 }
  0xb4   : > { %v484_v6 = vadd.f32 %v483_v5, %v482_v4  ;;  %v562_v57 = vpop.permute.xlu1 %561  ;;  %v577_v4 = vpop.permute.xlu0 %576 }
  0xb6   : > { %v485_v7 = vrot.slane %v484_v6, 1 }
  0xb8   : > { %v486_v8 = vadd.f32 %v485_v7, %v484_v6 }
  0xba   : > { %v488_v9 = vmul.f32 0.0625, %v486_v8 }
  0xbc   : > { %v489_v10 = vsub.f32 %v478_v0, %v488_v9  ;;  %v490_v11 = vsub.f32 %v479_v1, %v488_v9  ;;  %v572_v1 = vpop.permute.xlu1 %571 }
  0xbe   : > { %v491_v12 = vmul.f32 %v489_v10, %v489_v10  ;;  %v492_v13 = vmul.f32 %v490_v11, %v490_v11 }
  0xc0   : > { %v493_v14 = vadd.f32 %v492_v13, %v491_v12 }
  0xc2   : > { %v494_v15 = vrot.slane %v493_v14, 4 }
  0xc4   : > { %v495_v16 = vadd.f32 %v494_v15, %v493_v14 }
  0xc6   : > { %v496_v17 = vrot.slane %v495_v16, 2 }
  0xc8   : > { %v497_v18 = vadd.f32 %v496_v17, %v495_v16 }
  0xca   : > { %v498_v19 = vrot.slane %v497_v18, 1 }
  0xcc   : > { %v499_v20 = vadd.f32 %v498_v19, %v497_v18 }
  0xce   : > { %v500_v21 = vmul.f32 0.0625, %v499_v20 }
  0xd0   : > { %v501_v22 = vadd.f32 1e-05, %v500_v21 }
  0xd2   : > { %1094 = vrsqrt.f32 %v501_v22 }
  0xdc   : > { %v1095_v25 = vpop.eup %1094 }
  0xdd   : > { %v504_v26 = vmul.f32 %v1095_v25, %v490_v11  ;;  %v503_v27 = vmul.f32 %v1095_v25, %v489_v10 }
  0xdf   : > { %v518_v28 = vmul.f32 %v515_v23, %v504_v26  ;;  %v517_v29 = vmul.f32 %v510_v24, %v503_v27 }
  0xe1   : > { %v531_v32 = vadd.f32 %v524_v30, %v517_v29  ;;  %v532_v33 = vadd.f32 %v529_v31, %v518_v28 }
  0xe3   : > { %v533_v34 = vmul.f32 1.442695, %v531_v32  ;;  %v535_v35 = vmul.f32 1.442695, %v532_v33 }
  0xe5   : > { %1096 = vpow2.f32 %v533_v34 }
  0xe6   : > { %1098 = vpow2.f32 %v535_v35 }
  0xef   : > { %v1097_v36 = vpop.eup %1096 }
  0xf0   : > { %v1099_v37 = vpop.eup %1098  ;;  %v537_v38 = vadd.f32 1.0, %v1097_v36 }
  0xf1   : > { %v538_v39 = vadd.f32 1.0, %v1099_v37 }
  0xf2   : > { %v539_v40 = vmul.f32 %v537_v38, %v537_v38 }
  0xf3   : > { %v540_v41 = vmul.f32 %v538_v39, %v538_v39 }
  0xf4   : > { %v541_v42 = vadd.f32 1.0, %v539_v40 }
  0xf5   : > { %v542_v43 = vadd.f32 1.0, %v540_v41 }
  0xf6   : > { %1100 = vrcp.f32 %v541_v42 }
  0xf7   : > { %1102 = vrcp.f32 %v542_v43 }
 0x100   : > { %v1101_v44 = vpop.eup %1100 }
 0x101   : > { %v1103_v45 = vpop.eup %1102  ;;  %v544_v46 = vmul.f32 2.0, %v1101_v44 }
 0x102   : > { %v546_v47 = vmul.f32 2.0, %v1103_v45 }
 0x103   : > { %v547_v48 = vsub.f32 1.0, %v544_v46 }
 0x104   : > { %v548_v49 = vsub.f32 1.0, %v546_v47 }
 0x105   : > { %v549_v50 = vmul.f32 %v547_v48, %v531_v32  ;;  %v719_v32 = vpop.permute.xlu1 %718 }
 0x106   : > { %v550_v51 = vmul.f32 %v548_v49, %v532_v33  ;;  %v724_v33 = vpop.permute.xlu0 %723 }
 0x108   : > { %v1026_v52 = vpack.c.bf16 %v550_v51, %v549_v50 }
 0x109   : > { %v747_v36 = vpop.permute.xlu1 %746 }
 0x10a   : > { %1027 = vmatprep.subr.bf16.mxu0 %v1026_v52  ;;  %v752_v37 = vpop.permute.xlu0 %751 }
 0x10b   : > { %1029 = vmatpush3.bf16.msra.mxu0 %v1026_v52 }
 0x10d   : > { %v729_v38 = vpop.permute.xlu1 %728 }
 0x10e   : > { %1010 = vmatmul.mubr.msk.f32.vlgmr.msra.gmra.mrb[0].mxu0 %vm579_vm0, %v552_v53  ;;  %v734_v39 = vpop.permute.xlu0 %733 }
 0x10f   : > { %1012 = vmatprep.mubr.msk.f32.mxu0 %vm579_vm0, %v553_v54 }
 0x111   : > { %v757_v49 = vpop.permute.xlu1 %756 }
 0x112   : > { %1013 = vmatmul.mubr.msk.f32.gmra.mrb[2].mxu0 %vm579_vm0, %v554_v55  ;;  %v762_v50 = vpop.permute.xlu0 %761 }
 0x1e1   : > { %v1011_v59 = vpop.f32.mrb[0].mxu0 }
 0x1e2   : > { %v664_v60 = vadd.f32 %v1011_v59, %v567_v58  ;;  %v658_v61 = vpop.f32.mrb[1].mxu0 }
 0x1e3   : > { %v659_v62 = vadd.f32 %v658_v61, %v562_v57 }
 0x1e5   : > { %v677_v63 = vadd.f32 %v664_v60, %v659_v62  ;;  %v1014_v0 = vpop.f32.mrb[2].mxu0 }
 0x1e6   : > { %v668_v2 = vpop.f32.mrb[3].mxu0  ;;  %v674_v5 = vadd.f32 %v1014_v0, %v577_v4 }
 0x1e7   : > { %v669_v3 = vadd.f32 %v668_v2, %v572_v1 }
 0x1e9   : > { %v678_v6 = vadd.f32 %v677_v63, %v669_v3 }
 0x1eb   : > { %v679_v7 = vadd.f32 %v678_v6, %v674_v5 }
 0x1ed   : > { %v680_v8 = vrot.slane %v679_v7, 4 }
 0x1ef   : > { %v681_v9 = vadd.f32 %v680_v8, %v679_v7 }
 0x1f1   : > { %v682_v10 = vrot.slane %v681_v9, 2 }
 0x1f3   : > { %v683_v11 = vadd.f32 %v682_v10, %v681_v9 }
 0x1f5   : > { %v684_v12 = vrot.slane %v683_v11, 1 }
 0x1f7   : > { %v685_v13 = vadd.f32 %v684_v12, %v683_v11 }
 0x1f9   : > { %v687_v14 = vmul.f32 0.03125, %v685_v13 }
 0x1fb   : > { %v688_v15 = vsub.f32 %v659_v62, %v687_v14  ;;  %v689_v16 = vsub.f32 %v664_v60, %v687_v14  ;;  %v690_v17 = vsub.f32 %v669_v3, %v687_v14  ;;  %v691_v18 = vsub.f32 %v674_v5, %v687_v14 }
 0x1fd   : > { %v692_v19 = vmul.f32 %v688_v15, %v688_v15  ;;  %v693_v20 = vmul.f32 %v689_v16, %v689_v16  ;;  %v694_v21 = vmul.f32 %v690_v17, %v690_v17  ;;  %v695_v23 = vmul.f32 %v691_v18, %v691_v18 }
 0x1ff   : > { %v696_v22 = vadd.f32 %v693_v20, %v692_v19 }
 0x201   : > { %v697_v24 = vadd.f32 %v696_v22, %v694_v21 }
 0x203   : > { %v698_v25 = vadd.f32 %v697_v24, %v695_v23 }
 0x205   : > { %v699_v26 = vrot.slane %v698_v25, 4 }
 0x207   : > { %v700_v27 = vadd.f32 %v699_v26, %v698_v25 }
 0x209   : > { %v701_v28 = vrot.slane %v700_v27, 2 }
 0x20b   : > { %v702_v29 = vadd.f32 %v701_v28, %v700_v27 }
 0x20d   : > { %v703_v30 = vrot.slane %v702_v29, 1 }
 0x20f   : > { %v704_v31 = vadd.f32 %v703_v30, %v702_v29  ;;  %v805_v29 = vld [vmem:[%s1457_s9 + $0x8] sm:$0xff]  ;;  %v816_v30 = vpop.permute.xlu0 %815 }
 0x211   : > { %v705_v34 = vmul.f32 0.03125, %v704_v31 }
 0x213   : > { %v706_v35 = vadd.f32 1e-05, %v705_v34 }
 0x215   : > { %1104 = vrsqrt.f32 %v706_v35 }
 0x21f   : > { %v1105_v40 = vpop.eup %1104 }
 0x220   : > { %v710_v41 = vmul.f32 %v1105_v40, %v690_v17  ;;  %v708_v42 = vmul.f32 %v1105_v40, %v688_v15  ;;  %v709_v43 = vmul.f32 %v1105_v40, %v689_v16  ;;  %v711_v44 = vmul.f32 %v1105_v40, %v691_v18 }
 0x222   : > { %v738_v45 = vmul.f32 %v729_v38, %v710_v41  ;;  %v736_v46 = vmul.f32 %v719_v32, %v708_v42  ;;  %v737_v47 = vmul.f32 %v724_v33, %v709_v43  ;;  %v739_v48 = vmul.f32 %v734_v39, %v711_v44  ;;  %v811_v32 = vpop.permute.xlu1 %810 }
 0x224   : > { %v764_v51 = vadd.f32 %v747_v36, %v736_v46  ;;  %v765_v52 = vadd.f32 %v752_v37, %v737_v47  ;;  %v766_v53 = vadd.f32 %v757_v49, %v738_v45  ;;  %v767_v54 = vadd.f32 %v762_v50, %v739_v48 }
 0x226   : > { %v768_v55 = vmul.f32 1.442695, %v764_v51  ;;  %v770_v56 = vmul.f32 1.442695, %v765_v52  ;;  %v772_v57 = vmul.f32 1.442695, %v766_v53 }
 0x227   : > { %v774_v58 = vmul.f32 1.442695, %v767_v54 }
 0x228   : > { %1106 = vpow2.f32 %v768_v55 }
 0x229   : > { %1108 = vpow2.f32 %v770_v56 }
 0x22a   : > { %1110 = vpow2.f32 %v772_v57 }
 0x22b   : > { %1112 = vpow2.f32 %v774_v58 }
 0x232   : > { %v1107_v59 = vpop.eup %1106 }
 0x233   : > { %v1109_v60 = vpop.eup %1108  ;;  %v776_v61 = vadd.f32 1.0, %v1107_v59 }
 0x234   : > { %v1111_v62 = vpop.eup %1110  ;;  %v777_v63 = vadd.f32 1.0, %v1109_v60 }
 0x235   : > { %v1113_v0 = vpop.eup %1112  ;;  %v780_v1 = vmul.f32 %v776_v61, %v776_v61  ;;  %v778_v2 = vadd.f32 1.0, %v1111_v62 }
 0x236   : > { %v781_v3 = vmul.f32 %v777_v63, %v777_v63  ;;  %v779_v4 = vadd.f32 1.0, %v1113_v0 }
 0x237   : > { %v784_v5 = vadd.f32 1.0, %v780_v1  ;;  %v782_v6 = vmul.f32 %v778_v2, %v778_v2 }
 0x238   : > { %v785_v7 = vadd.f32 1.0, %v781_v3  ;;  %v783_v8 = vmul.f32 %v779_v4, %v779_v4 }
 0x239   : > { %1114 = vrcp.f32 %v784_v5  ;;  %v786_v9 = vadd.f32 1.0, %v782_v6 }
 0x23a   : > { %1116 = vrcp.f32 %v785_v7  ;;  %v787_v10 = vadd.f32 1.0, %v783_v8 }
 0x23b   : > { %1118 = vrcp.f32 %v786_v9 }
 0x23c   : > { %1120 = vrcp.f32 %v787_v10 }
 0x243   : > { %v1115_v11 = vpop.eup %1114 }
 0x244   : > { %v1117_v12 = vpop.eup %1116  ;;  %v789_v13 = vmul.f32 2.0, %v1115_v11 }
 0x245   : > { %v1119_v14 = vpop.eup %1118  ;;  %v791_v15 = vmul.f32 2.0, %v1117_v12 }
 0x246   : > { %v1121_v16 = vpop.eup %1120  ;;  %v796_v17 = vsub.f32 1.0, %v789_v13  ;;  %v793_v18 = vmul.f32 2.0, %v1119_v14 }
 0x247   : > { %v797_v19 = vsub.f32 1.0, %v791_v15  ;;  %v795_v20 = vmul.f32 2.0, %v1121_v16 }
 0x248   : > { %v800_v21 = vmul.f32 %v796_v17, %v764_v51  ;;  %v798_v22 = vsub.f32 1.0, %v793_v18 }
 0x249   : > { %v801_v23 = vmul.f32 %v797_v19, %v765_v52  ;;  %v799_v24 = vsub.f32 1.0, %v795_v20 }
 0x24a   : > { %v802_v25 = vmul.f32 %v798_v22, %v766_v53 }
 0x24b   : > { %v1030_v26 = vpack.c.bf16 %v801_v23, %v800_v21  ;;  %v803_v27 = vmul.f32 %v799_v24, %v767_v54 }
 0x24d   : > { %1031 = vmatprep.subr.bf16.mxu1 %v1030_v26  ;;  %v1034_v28 = vpack.c.bf16 %v803_v27, %v802_v25 }
 0x24e   : > { %1033 = vmatpush3.bf16.msra.mxu1 %v1030_v26 }
 0x24f   : > { %1035 = vmatprep.subr.bf16.mxu1 %v1034_v28 }
 0x252   : > { %1037 = vmatpush3.bf16.msra.mxu1 %v1034_v28 }
 0x255   : > { %1024 = vmatmul.mubr.msk.f32.vlgmr.msra.gmra.mrb[0].mxu1 %vm818_vm5, %v805_v29 }
 0x328   : > { %v1025_v31 = vpop.f32.mrb[0].mxu1 }
 0x329   : > { %v897_v33 = vadd.f32 %v1025_v31, %v816_v30  ;;  %v891_v34 = vpop.f32.mrb[1].mxu1 }
 0x32a   : > { %v892_v35 = vadd.f32 %v891_v34, %v811_v32 }
 0x32b   : > { %901 = vst [vmem:[%s375_s12 + $0x8] sm:$0xff] %v897_v33 }
 0x32c   : > { %900 = vst [vmem:[%s375_s12] sm:$0xff] %v892_v35 }
 0x32d   : > { %1135 = shalt.err (!%p1132_p3)
}
 0x32e   : > { %s1136_s29 = scalar_lea.hbm %s1405_s22, 256  ;;  %s1140_s15 = scalar_lea.hbm %s1459_s11, 768 }
 0x32f   : > { %p1137_p4 = scmp.ne.s32.totalorder %s1405_s22, %s1136_s29  ;;  %p1141_p9 = scmp.lt.u32.totalorder %s1405_s22, %s1459_s11 }
 0x330   : > { %p1142_p10 = scmp.lt.u32.totalorder %s1140_s15, %s1136_s29  ;;  %p1144_p12 = scmp.lt.u32.totalorder %s1136_s29, %s1405_s22 }
 0x331   : > { %p1138_p7 = pnand %p1137_p4, %p1293_p5 }
 0x332   : > { %p1143_p11 = por %p1142_p10, %p1141_p9 }
 0x333   : > { %p1139_p8 = pneg %p1138_p7 }
 0x334   : > { %p1145_p13 = por %p1144_p12, %p1143_p11 }
 0x336   : > { %p1146_p0 = pnand %p1145_p13, %p1139_p8 }
 0x338   : > { %1149 = shalt.err (!%p1146_p0)
}
 0x339   : > { %s1192_s0 = smov 128   ;;  %s1193_s21 = smov 384  }
 0x33a   : > { %s1194_s30 = smov 8  }
 0x33b   : > { %1038 = dma.vmem_to_hbm [thread:$0]  (%p1293_p5), %s1400_s13, 256, %s1405_s22, %s1407_s24, %s1192_s0, %s1193_s21, %s1194_s30  }
 0x33c PF: > { %p1044_p1 = scmp.ge.s32.totalorder %s1184_s20, 2  ;;  %s930_s12 = sand.u32 1, %s1172_s17  }
 0x33d   : > { %s931_s29 = scalar_lea.sflag [#allocation3], %s930_s12 }
 0x33e   : > { %p1041_p2 = pnand %p1044_p1, %p1297_p6 }
 0x340   : > { %1167 = dma.done.wait (!%p1041_p2), %s931_s29, 256  }
 0x341   : > { %1169 = vsyncadd (!%p1041_p2), %s931_s29, 4294967040  ;;  %p21_p3 = scmp.ge.s32.totalorder %s1280_s23, 5   ;;  %s1464_s17 = smov %s1176_s18 }
 0x342   : > { %s1465_s18 = smov %s1180_s19  ;;  %s1466_s19 = smov %s1291_s26 }
 0x343   : > { %s1467_s20 = smov %s1280_s23  ;;  %23 = sbr.rel (!%p21_p3) target bundleno = 5 (0x5), region = 99 }
 0x34a   :  { %936 = vsyncpa [#allocation3], 1 }
 0x34b   :  { %938 = vsyncpa [#allocation3 + $0x1], 1 }

</bundles_post_ra>
